<compile_context>
chip_gen: v7x
topology: tpu7x:2x2x1
jax: 0.10.0
libtpu: 0.0.40
codegen_flags: <defaults>
</compile_context>

<pallas_src>
import jax
import jax.numpy as jnp
from jax.experimental import pallas as pl
from jax.experimental.pallas import tpu as pltpu

_RRELU_SLOPE = (1.0 / 8.0 + 1.0 / 3.0) / 2.0  # 11/48 (eval-mode RReLU slope)
_LANE = 128
_MAX_TILE_B = 2048  # rows (lanes) per grid step; small VMEM footprint on all chips


def _make_kernel(f_in, h, c):
    """Build the fused kernel for feature sizes f_in -> h -> c -> h -> f_in."""
    # Offsets into the packed [w1, b1, w2, b2, w3, b3, w4, b4] SMEM slab.
    sizes = [f_in * h, h, h * c, c, c * h, h, h * f_in, f_in]
    offs, o = [], 0
    for s in sizes:
        offs.append(o)
        o += s
    ow1, ob1, ow2, ob2, ow3, ob3, ow4, ob4 = offs
    slope = float(_RRELU_SLOPE)  # plain Python float: no captured jax constant

    def layer(p_ref, rows_in, k, n, w_off, b_off, act):
        # rows_in: k arrays of shape [1, TILE_B]; weights row-major [k, n] in the slab.
        rows_out = []
        for j in range(n):
            acc = rows_in[0] * p_ref[w_off + j]
            for kk in range(1, k):
                acc = acc + rows_in[kk] * p_ref[w_off + kk * n + j]
            acc = acc + p_ref[b_off + j]
            if act:
                acc = jnp.where(acc >= 0, acc, slope * acc)  # eval-mode RReLU
            rows_out.append(acc)
        return rows_out

    def kernel(p_ref, x_ref, o_ref):
        # x_ref / o_ref: [f_in, TILE_B]  (features on sublanes, batch on lanes)
        rows = [x_ref[k:k + 1, :] for k in range(f_in)]      # each [1, TILE_B]
        rows = layer(p_ref, rows, f_in, h, ow1, ob1, True)   # encoder 1
        rows = layer(p_ref, rows, h, c, ow2, ob2, True)      # encoder 2 (code)
        rows = layer(p_ref, rows, c, h, ow3, ob3, True)      # decoder 1
        rows = layer(p_ref, rows, h, f_in, ow4, ob4, False)  # decoder 2
        for j in range(f_in):
            o_ref[j:j + 1, :] = rows[j]

    return kernel


def autoencoder_forward(x, params, tile_b=None):
    """x: [batch, input_size] f32. params: list of (W, b) with W=[in, out], b=[1, out]."""
    (w1, b1), (w2, b2), (w3, b3), (w4, b4) = params
    batch, f_in = x.shape
    h = w1.shape[1]
    c = w2.shape[1]
    assert w1.shape == (f_in, h) and w2.shape == (h, c)
    assert w3.shape == (c, h) and w4.shape == (h, f_in)

    if tile_b is None:
        tile_b = min(_MAX_TILE_B, -(-batch // _LANE) * _LANE)
    tile_b = max(_LANE, (tile_b // _LANE) * _LANE)
    n_tiles = -(-batch // tile_b)
    padded = n_tiles * tile_b

    # One packed param slab (76 floats for the demo sizes), resident in SMEM.
    flat = jnp.concatenate([
        w1.reshape(-1), b1.reshape(-1), w2.reshape(-1), b2.reshape(-1),
        w3.reshape(-1), b3.reshape(-1), w4.reshape(-1), b4.reshape(-1),
    ]).astype(jnp.float32)

    # Layout plumbing: put batch on the 128-lane axis so kernel loads/stores are lane-dense.
    xt = jnp.transpose(x.astype(jnp.float32))  # [f_in, batch]
    if padded != batch:
        xt = jnp.pad(xt, ((0, 0), (0, padded - batch)))

    kernel = _make_kernel(f_in, h, c)
    out_t = pl.pallas_call(
        kernel,
        out_shape=jax.ShapeDtypeStruct((f_in, padded), jnp.float32),
        grid=(n_tiles,),
        in_specs=[
            pl.BlockSpec(memory_space=pltpu.MemorySpace.SMEM),  # packed weights+biases
            pl.BlockSpec((f_in, tile_b), lambda i: (0, i)),     # x tile (batch on lanes)
        ],
        out_specs=pl.BlockSpec((f_in, tile_b), lambda i: (0, i)),
        compiler_params=pltpu.CompilerParams(
            dimension_semantics=("parallel",)),
    )(flat, xt)

    return jnp.transpose(out_t[:, :batch])  # back to [batch, f_in]


def init_linear(key, fan_in, fan_out):
    """PyTorch nn.Linear default init: U(-1/sqrt(fan_in), 1/sqrt(fan_in))."""
    kw, kb = jax.random.split(key)
    bound = 1.0 / float(fan_in) ** 0.5
    w = jax.random.uniform(kw, (fan_in, fan_out), jnp.float32, -bound, bound)
    b = jax.random.uniform(kb, (1, fan_out), jnp.float32, -bound, bound)
    return w, b


def reference_forward(x, params):
    h = x
    for i, (w, b) in enumerate(params):
        h = h @ w + b
        if i < 3:  # RReLU (eval mode) after the first three Linear layers
            h = jnp.where(h >= 0, h, jnp.float32(_RRELU_SLOPE) * h)
    return h


if __name__ == "__main__":
    # Small shapes consistent with the module: rows of MinMax-scaled tabular welding data.
    batch = 8
    input_size = 8
    hidden_size = [3]
    output_size = 2

    key = jax.random.PRNGKey(0)
    kx, k1, k2, k3, k4, kx2 = jax.random.split(key, 6)

    x = jax.random.uniform(kx, (batch, input_size), jnp.float32)  # data in [0, 1]

    params = [
        init_linear(k1, input_size, hidden_size[0]),
        init_linear(k2, hidden_size[0], output_size),
        init_linear(k3, output_size, hidden_size[0]),
        init_linear(k4, hidden_size[0], input_size),
    ]

    out = jax.block_until_ready(autoencoder_forward(x, params))
    ref = reference_forward(x, params)
    assert out.shape == (batch, input_size)
    assert jnp.allclose(out, ref, atol=1e-5, rtol=1e-5), "mismatch vs JAX reference (batch=8)"

    # Exercise the multi-tile grid + padding path (5 grid steps of 128 rows, 120 padded rows).
    batch2 = 520
    x2 = jax.random.uniform(kx2, (batch2, input_size), jnp.float32)
    out2 = jax.block_until_ready(autoencoder_forward(x2, params, tile_b=128))
    ref2 = reference_forward(x2, params)
    assert out2.shape == (batch2, input_size)
    assert jnp.allclose(out2, ref2, atol=1e-5, rtol=1e-5), "mismatch vs JAX reference (batch=520)"

    print("KERNEL_OK")
</pallas_src>

<mosaic_0001>
module attributes {stable_mosaic.version = 11 : i64} {
  func.func @kernel(%arg0: i32, %arg1: memref<76xf32, #tpu.memory_space<smem>>, %arg2: memref<8x128xf32, #tpu.memory_space<vmem>>, %arg3: memref<8x128xf32, #tpu.memory_space<vmem>>) attributes {dimension_semantics = [#tpu.dimension_semantics<parallel>], iteration_bounds = array<i64: 1>, scalar_prefetch = 0 : i64, scratch_operands = 0 : i64, tpu.core_type = #tpu.core_type<tc>, window_params = [{transform_indices = @transform_0, window_bounds = array<i64: 76>}, {transform_indices = @transform_1, window_bounds = array<i64: 8, 128>}, {transform_indices = @transform_2, window_bounds = array<i64: 8, 128>}]} {
    %c0 = arith.constant 0 : index
    %c0_0 = arith.constant 0 : index
    %0 = vector.load %arg2[%c0, %c0_0] : memref<8x128xf32, #tpu.memory_space<vmem>>, vector<1x128xf32>
    %c1 = arith.constant 1 : index
    %c0_1 = arith.constant 0 : index
    %1 = vector.load %arg2[%c1, %c0_1] : memref<8x128xf32, #tpu.memory_space<vmem>>, vector<1x128xf32>
    %c2 = arith.constant 2 : index
    %c0_2 = arith.constant 0 : index
    %2 = vector.load %arg2[%c2, %c0_2] : memref<8x128xf32, #tpu.memory_space<vmem>>, vector<1x128xf32>
    %c3 = arith.constant 3 : index
    %c0_3 = arith.constant 0 : index
    %3 = vector.load %arg2[%c3, %c0_3] : memref<8x128xf32, #tpu.memory_space<vmem>>, vector<1x128xf32>
    %c4 = arith.constant 4 : index
    %c0_4 = arith.constant 0 : index
    %4 = vector.load %arg2[%c4, %c0_4] : memref<8x128xf32, #tpu.memory_space<vmem>>, vector<1x128xf32>
    %c5 = arith.constant 5 : index
    %c0_5 = arith.constant 0 : index
    %5 = vector.load %arg2[%c5, %c0_5] : memref<8x128xf32, #tpu.memory_space<vmem>>, vector<1x128xf32>
    %c6 = arith.constant 6 : index
    %c0_6 = arith.constant 0 : index
    %6 = vector.load %arg2[%c6, %c0_6] : memref<8x128xf32, #tpu.memory_space<vmem>>, vector<1x128xf32>
    %c7 = arith.constant 7 : index
    %c0_7 = arith.constant 0 : index
    %7 = vector.load %arg2[%c7, %c0_7] : memref<8x128xf32, #tpu.memory_space<vmem>>, vector<1x128xf32>
    %c0_8 = arith.constant 0 : index
    %8 = memref.load %arg1[%c0_8] : memref<76xf32, #tpu.memory_space<smem>>
    %9 = vector.broadcast %8 : f32 to vector<1x128xf32>
    %10 = arith.mulf %0, %9 : vector<1x128xf32>
    %c3_9 = arith.constant 3 : index
    %11 = memref.load %arg1[%c3_9] : memref<76xf32, #tpu.memory_space<smem>>
    %12 = vector.broadcast %11 : f32 to vector<1x128xf32>
    %13 = arith.mulf %1, %12 : vector<1x128xf32>
    %14 = arith.addf %10, %13 : vector<1x128xf32>
    %c6_10 = arith.constant 6 : index
    %15 = memref.load %arg1[%c6_10] : memref<76xf32, #tpu.memory_space<smem>>
    %16 = vector.broadcast %15 : f32 to vector<1x128xf32>
    %17 = arith.mulf %2, %16 : vector<1x128xf32>
    %18 = arith.addf %14, %17 : vector<1x128xf32>
    %c9 = arith.constant 9 : index
    %19 = memref.load %arg1[%c9] : memref<76xf32, #tpu.memory_space<smem>>
    %20 = vector.broadcast %19 : f32 to vector<1x128xf32>
    %21 = arith.mulf %3, %20 : vector<1x128xf32>
    %22 = arith.addf %18, %21 : vector<1x128xf32>
    %c12 = arith.constant 12 : index
    %23 = memref.load %arg1[%c12] : memref<76xf32, #tpu.memory_space<smem>>
    %24 = vector.broadcast %23 : f32 to vector<1x128xf32>
    %25 = arith.mulf %4, %24 : vector<1x128xf32>
    %26 = arith.addf %22, %25 : vector<1x128xf32>
    %c15 = arith.constant 15 : index
    %27 = memref.load %arg1[%c15] : memref<76xf32, #tpu.memory_space<smem>>
    %28 = vector.broadcast %27 : f32 to vector<1x128xf32>
    %29 = arith.mulf %5, %28 : vector<1x128xf32>
    %30 = arith.addf %26, %29 : vector<1x128xf32>
    %c18 = arith.constant 18 : index
    %31 = memref.load %arg1[%c18] : memref<76xf32, #tpu.memory_space<smem>>
    %32 = vector.broadcast %31 : f32 to vector<1x128xf32>
    %33 = arith.mulf %6, %32 : vector<1x128xf32>
    %34 = arith.addf %30, %33 : vector<1x128xf32>
    %c21 = arith.constant 21 : index
    %35 = memref.load %arg1[%c21] : memref<76xf32, #tpu.memory_space<smem>>
    %36 = vector.broadcast %35 : f32 to vector<1x128xf32>
    %37 = arith.mulf %7, %36 : vector<1x128xf32>
    %38 = arith.addf %34, %37 : vector<1x128xf32>
    %c24 = arith.constant 24 : index
    %39 = memref.load %arg1[%c24] : memref<76xf32, #tpu.memory_space<smem>>
    %40 = vector.broadcast %39 : f32 to vector<1x128xf32>
    %41 = arith.addf %38, %40 : vector<1x128xf32>
    %cst = arith.constant 0.000000e+00 : f32
    %42 = vector.broadcast %cst : f32 to vector<1x128xf32>
    %43 = arith.cmpf oge, %41, %42 : vector<1x128xf32>
    %cst_11 = arith.constant 0.229166672 : f32
    %44 = vector.broadcast %cst_11 : f32 to vector<1x128xf32>
    %45 = arith.mulf %44, %41 : vector<1x128xf32>
    %46 = arith.select %43, %41, %45 : vector<1x128xi1>, vector<1x128xf32>
    %c1_12 = arith.constant 1 : index
    %47 = memref.load %arg1[%c1_12] : memref<76xf32, #tpu.memory_space<smem>>
    %48 = vector.broadcast %47 : f32 to vector<1x128xf32>
    %49 = arith.mulf %0, %48 : vector<1x128xf32>
    %c4_13 = arith.constant 4 : index
    %50 = memref.load %arg1[%c4_13] : memref<76xf32, #tpu.memory_space<smem>>
    %51 = vector.broadcast %50 : f32 to vector<1x128xf32>
    %52 = arith.mulf %1, %51 : vector<1x128xf32>
    %53 = arith.addf %49, %52 : vector<1x128xf32>
    %c7_14 = arith.constant 7 : index
    %54 = memref.load %arg1[%c7_14] : memref<76xf32, #tpu.memory_space<smem>>
    %55 = vector.broadcast %54 : f32 to vector<1x128xf32>
    %56 = arith.mulf %2, %55 : vector<1x128xf32>
    %57 = arith.addf %53, %56 : vector<1x128xf32>
    %c10 = arith.constant 10 : index
    %58 = memref.load %arg1[%c10] : memref<76xf32, #tpu.memory_space<smem>>
    %59 = vector.broadcast %58 : f32 to vector<1x128xf32>
    %60 = arith.mulf %3, %59 : vector<1x128xf32>
    %61 = arith.addf %57, %60 : vector<1x128xf32>
    %c13 = arith.constant 13 : index
    %62 = memref.load %arg1[%c13] : memref<76xf32, #tpu.memory_space<smem>>
    %63 = vector.broadcast %62 : f32 to vector<1x128xf32>
    %64 = arith.mulf %4, %63 : vector<1x128xf32>
    %65 = arith.addf %61, %64 : vector<1x128xf32>
    %c16 = arith.constant 16 : index
    %66 = memref.load %arg1[%c16] : memref<76xf32, #tpu.memory_space<smem>>
    %67 = vector.broadcast %66 : f32 to vector<1x128xf32>
    %68 = arith.mulf %5, %67 : vector<1x128xf32>
    %69 = arith.addf %65, %68 : vector<1x128xf32>
    %c19 = arith.constant 19 : index
    %70 = memref.load %arg1[%c19] : memref<76xf32, #tpu.memory_space<smem>>
    %71 = vector.broadcast %70 : f32 to vector<1x128xf32>
    %72 = arith.mulf %6, %71 : vector<1x128xf32>
    %73 = arith.addf %69, %72 : vector<1x128xf32>
    %c22 = arith.constant 22 : index
    %74 = memref.load %arg1[%c22] : memref<76xf32, #tpu.memory_space<smem>>
    %75 = vector.broadcast %74 : f32 to vector<1x128xf32>
    %76 = arith.mulf %7, %75 : vector<1x128xf32>
    %77 = arith.addf %73, %76 : vector<1x128xf32>
    %c25 = arith.constant 25 : index
    %78 = memref.load %arg1[%c25] : memref<76xf32, #tpu.memory_space<smem>>
    %79 = vector.broadcast %78 : f32 to vector<1x128xf32>
    %80 = arith.addf %77, %79 : vector<1x128xf32>
    %cst_15 = arith.constant 0.000000e+00 : f32
    %81 = vector.broadcast %cst_15 : f32 to vector<1x128xf32>
    %82 = arith.cmpf oge, %80, %81 : vector<1x128xf32>
    %cst_16 = arith.constant 0.229166672 : f32
    %83 = vector.broadcast %cst_16 : f32 to vector<1x128xf32>
    %84 = arith.mulf %83, %80 : vector<1x128xf32>
    %85 = arith.select %82, %80, %84 : vector<1x128xi1>, vector<1x128xf32>
    %c2_17 = arith.constant 2 : index
    %86 = memref.load %arg1[%c2_17] : memref<76xf32, #tpu.memory_space<smem>>
    %87 = vector.broadcast %86 : f32 to vector<1x128xf32>
    %88 = arith.mulf %0, %87 : vector<1x128xf32>
    %c5_18 = arith.constant 5 : index
    %89 = memref.load %arg1[%c5_18] : memref<76xf32, #tpu.memory_space<smem>>
    %90 = vector.broadcast %89 : f32 to vector<1x128xf32>
    %91 = arith.mulf %1, %90 : vector<1x128xf32>
    %92 = arith.addf %88, %91 : vector<1x128xf32>
    %c8 = arith.constant 8 : index
    %93 = memref.load %arg1[%c8] : memref<76xf32, #tpu.memory_space<smem>>
    %94 = vector.broadcast %93 : f32 to vector<1x128xf32>
    %95 = arith.mulf %2, %94 : vector<1x128xf32>
    %96 = arith.addf %92, %95 : vector<1x128xf32>
    %c11 = arith.constant 11 : index
    %97 = memref.load %arg1[%c11] : memref<76xf32, #tpu.memory_space<smem>>
    %98 = vector.broadcast %97 : f32 to vector<1x128xf32>
    %99 = arith.mulf %3, %98 : vector<1x128xf32>
    %100 = arith.addf %96, %99 : vector<1x128xf32>
    %c14 = arith.constant 14 : index
    %101 = memref.load %arg1[%c14] : memref<76xf32, #tpu.memory_space<smem>>
    %102 = vector.broadcast %101 : f32 to vector<1x128xf32>
    %103 = arith.mulf %4, %102 : vector<1x128xf32>
    %104 = arith.addf %100, %103 : vector<1x128xf32>
    %c17 = arith.constant 17 : index
    %105 = memref.load %arg1[%c17] : memref<76xf32, #tpu.memory_space<smem>>
    %106 = vector.broadcast %105 : f32 to vector<1x128xf32>
    %107 = arith.mulf %5, %106 : vector<1x128xf32>
    %108 = arith.addf %104, %107 : vector<1x128xf32>
    %c20 = arith.constant 20 : index
    %109 = memref.load %arg1[%c20] : memref<76xf32, #tpu.memory_space<smem>>
    %110 = vector.broadcast %109 : f32 to vector<1x128xf32>
    %111 = arith.mulf %6, %110 : vector<1x128xf32>
    %112 = arith.addf %108, %111 : vector<1x128xf32>
    %c23 = arith.constant 23 : index
    %113 = memref.load %arg1[%c23] : memref<76xf32, #tpu.memory_space<smem>>
    %114 = vector.broadcast %113 : f32 to vector<1x128xf32>
    %115 = arith.mulf %7, %114 : vector<1x128xf32>
    %116 = arith.addf %112, %115 : vector<1x128xf32>
    %c26 = arith.constant 26 : index
    %117 = memref.load %arg1[%c26] : memref<76xf32, #tpu.memory_space<smem>>
    %118 = vector.broadcast %117 : f32 to vector<1x128xf32>
    %119 = arith.addf %116, %118 : vector<1x128xf32>
    %cst_19 = arith.constant 0.000000e+00 : f32
    %120 = vector.broadcast %cst_19 : f32 to vector<1x128xf32>
    %121 = arith.cmpf oge, %119, %120 : vector<1x128xf32>
    %cst_20 = arith.constant 0.229166672 : f32
    %122 = vector.broadcast %cst_20 : f32 to vector<1x128xf32>
    %123 = arith.mulf %122, %119 : vector<1x128xf32>
    %124 = arith.select %121, %119, %123 : vector<1x128xi1>, vector<1x128xf32>
    %c27 = arith.constant 27 : index
    %125 = memref.load %arg1[%c27] : memref<76xf32, #tpu.memory_space<smem>>
    %126 = vector.broadcast %125 : f32 to vector<1x128xf32>
    %127 = arith.mulf %46, %126 : vector<1x128xf32>
    %c29 = arith.constant 29 : index
    %128 = memref.load %arg1[%c29] : memref<76xf32, #tpu.memory_space<smem>>
    %129 = vector.broadcast %128 : f32 to vector<1x128xf32>
    %130 = arith.mulf %85, %129 : vector<1x128xf32>
    %131 = arith.addf %127, %130 : vector<1x128xf32>
    %c31 = arith.constant 31 : index
    %132 = memref.load %arg1[%c31] : memref<76xf32, #tpu.memory_space<smem>>
    %133 = vector.broadcast %132 : f32 to vector<1x128xf32>
    %134 = arith.mulf %124, %133 : vector<1x128xf32>
    %135 = arith.addf %131, %134 : vector<1x128xf32>
    %c33 = arith.constant 33 : index
    %136 = memref.load %arg1[%c33] : memref<76xf32, #tpu.memory_space<smem>>
    %137 = vector.broadcast %136 : f32 to vector<1x128xf32>
    %138 = arith.addf %135, %137 : vector<1x128xf32>
    %cst_21 = arith.constant 0.000000e+00 : f32
    %139 = vector.broadcast %cst_21 : f32 to vector<1x128xf32>
    %140 = arith.cmpf oge, %138, %139 : vector<1x128xf32>
    %cst_22 = arith.constant 0.229166672 : f32
    %141 = vector.broadcast %cst_22 : f32 to vector<1x128xf32>
    %142 = arith.mulf %141, %138 : vector<1x128xf32>
    %143 = arith.select %140, %138, %142 : vector<1x128xi1>, vector<1x128xf32>
    %c28 = arith.constant 28 : index
    %144 = memref.load %arg1[%c28] : memref<76xf32, #tpu.memory_space<smem>>
    %145 = vector.broadcast %144 : f32 to vector<1x128xf32>
    %146 = arith.mulf %46, %145 : vector<1x128xf32>
    %c30 = arith.constant 30 : index
    %147 = memref.load %arg1[%c30] : memref<76xf32, #tpu.memory_space<smem>>
    %148 = vector.broadcast %147 : f32 to vector<1x128xf32>
    %149 = arith.mulf %85, %148 : vector<1x128xf32>
    %150 = arith.addf %146, %149 : vector<1x128xf32>
    %c32 = arith.constant 32 : index
    %151 = memref.load %arg1[%c32] : memref<76xf32, #tpu.memory_space<smem>>
    %152 = vector.broadcast %151 : f32 to vector<1x128xf32>
    %153 = arith.mulf %124, %152 : vector<1x128xf32>
    %154 = arith.addf %150, %153 : vector<1x128xf32>
    %c34 = arith.constant 34 : index
    %155 = memref.load %arg1[%c34] : memref<76xf32, #tpu.memory_space<smem>>
    %156 = vector.broadcast %155 : f32 to vector<1x128xf32>
    %157 = arith.addf %154, %156 : vector<1x128xf32>
    %cst_23 = arith.constant 0.000000e+00 : f32
    %158 = vector.broadcast %cst_23 : f32 to vector<1x128xf32>
    %159 = arith.cmpf oge, %157, %158 : vector<1x128xf32>
    %cst_24 = arith.constant 0.229166672 : f32
    %160 = vector.broadcast %cst_24 : f32 to vector<1x128xf32>
    %161 = arith.mulf %160, %157 : vector<1x128xf32>
    %162 = arith.select %159, %157, %161 : vector<1x128xi1>, vector<1x128xf32>
    %c35 = arith.constant 35 : index
    %163 = memref.load %arg1[%c35] : memref<76xf32, #tpu.memory_space<smem>>
    %164 = vector.broadcast %163 : f32 to vector<1x128xf32>
    %165 = arith.mulf %143, %164 : vector<1x128xf32>
    %c38 = arith.constant 38 : index
    %166 = memref.load %arg1[%c38] : memref<76xf32, #tpu.memory_space<smem>>
    %167 = vector.broadcast %166 : f32 to vector<1x128xf32>
    %168 = arith.mulf %162, %167 : vector<1x128xf32>
    %169 = arith.addf %165, %168 : vector<1x128xf32>
    %c41 = arith.constant 41 : index
    %170 = memref.load %arg1[%c41] : memref<76xf32, #tpu.memory_space<smem>>
    %171 = vector.broadcast %170 : f32 to vector<1x128xf32>
    %172 = arith.addf %169, %171 : vector<1x128xf32>
    %cst_25 = arith.constant 0.000000e+00 : f32
    %173 = vector.broadcast %cst_25 : f32 to vector<1x128xf32>
    %174 = arith.cmpf oge, %172, %173 : vector<1x128xf32>
    %cst_26 = arith.constant 0.229166672 : f32
    %175 = vector.broadcast %cst_26 : f32 to vector<1x128xf32>
    %176 = arith.mulf %175, %172 : vector<1x128xf32>
    %177 = arith.select %174, %172, %176 : vector<1x128xi1>, vector<1x128xf32>
    %c36 = arith.constant 36 : index
    %178 = memref.load %arg1[%c36] : memref<76xf32, #tpu.memory_space<smem>>
    %179 = vector.broadcast %178 : f32 to vector<1x128xf32>
    %180 = arith.mulf %143, %179 : vector<1x128xf32>
    %c39 = arith.constant 39 : index
    %181 = memref.load %arg1[%c39] : memref<76xf32, #tpu.memory_space<smem>>
    %182 = vector.broadcast %181 : f32 to vector<1x128xf32>
    %183 = arith.mulf %162, %182 : vector<1x128xf32>
    %184 = arith.addf %180, %183 : vector<1x128xf32>
    %c42 = arith.constant 42 : index
    %185 = memref.load %arg1[%c42] : memref<76xf32, #tpu.memory_space<smem>>
    %186 = vector.broadcast %185 : f32 to vector<1x128xf32>
    %187 = arith.addf %184, %186 : vector<1x128xf32>
    %cst_27 = arith.constant 0.000000e+00 : f32
    %188 = vector.broadcast %cst_27 : f32 to vector<1x128xf32>
    %189 = arith.cmpf oge, %187, %188 : vector<1x128xf32>
    %cst_28 = arith.constant 0.229166672 : f32
    %190 = vector.broadcast %cst_28 : f32 to vector<1x128xf32>
    %191 = arith.mulf %190, %187 : vector<1x128xf32>
    %192 = arith.select %189, %187, %191 : vector<1x128xi1>, vector<1x128xf32>
    %c37 = arith.constant 37 : index
    %193 = memref.load %arg1[%c37] : memref<76xf32, #tpu.memory_space<smem>>
    %194 = vector.broadcast %193 : f32 to vector<1x128xf32>
    %195 = arith.mulf %143, %194 : vector<1x128xf32>
    %c40 = arith.constant 40 : index
    %196 = memref.load %arg1[%c40] : memref<76xf32, #tpu.memory_space<smem>>
    %197 = vector.broadcast %196 : f32 to vector<1x128xf32>
    %198 = arith.mulf %162, %197 : vector<1x128xf32>
    %199 = arith.addf %195, %198 : vector<1x128xf32>
    %c43 = arith.constant 43 : index
    %200 = memref.load %arg1[%c43] : memref<76xf32, #tpu.memory_space<smem>>
    %201 = vector.broadcast %200 : f32 to vector<1x128xf32>
    %202 = arith.addf %199, %201 : vector<1x128xf32>
    %cst_29 = arith.constant 0.000000e+00 : f32
    %203 = vector.broadcast %cst_29 : f32 to vector<1x128xf32>
    %204 = arith.cmpf oge, %202, %203 : vector<1x128xf32>
    %cst_30 = arith.constant 0.229166672 : f32
    %205 = vector.broadcast %cst_30 : f32 to vector<1x128xf32>
    %206 = arith.mulf %205, %202 : vector<1x128xf32>
    %207 = arith.select %204, %202, %206 : vector<1x128xi1>, vector<1x128xf32>
    %c44 = arith.constant 44 : index
    %208 = memref.load %arg1[%c44] : memref<76xf32, #tpu.memory_space<smem>>
    %209 = vector.broadcast %208 : f32 to vector<1x128xf32>
    %210 = arith.mulf %177, %209 : vector<1x128xf32>
    %c52 = arith.constant 52 : index
    %211 = memref.load %arg1[%c52] : memref<76xf32, #tpu.memory_space<smem>>
    %212 = vector.broadcast %211 : f32 to vector<1x128xf32>
    %213 = arith.mulf %192, %212 : vector<1x128xf32>
    %214 = arith.addf %210, %213 : vector<1x128xf32>
    %c60 = arith.constant 60 : index
    %215 = memref.load %arg1[%c60] : memref<76xf32, #tpu.memory_space<smem>>
    %216 = vector.broadcast %215 : f32 to vector<1x128xf32>
    %217 = arith.mulf %207, %216 : vector<1x128xf32>
    %218 = arith.addf %214, %217 : vector<1x128xf32>
    %c68 = arith.constant 68 : index
    %219 = memref.load %arg1[%c68] : memref<76xf32, #tpu.memory_space<smem>>
    %220 = vector.broadcast %219 : f32 to vector<1x128xf32>
    %221 = arith.addf %218, %220 : vector<1x128xf32>
    %c45 = arith.constant 45 : index
    %222 = memref.load %arg1[%c45] : memref<76xf32, #tpu.memory_space<smem>>
    %223 = vector.broadcast %222 : f32 to vector<1x128xf32>
    %224 = arith.mulf %177, %223 : vector<1x128xf32>
    %c53 = arith.constant 53 : index
    %225 = memref.load %arg1[%c53] : memref<76xf32, #tpu.memory_space<smem>>
    %226 = vector.broadcast %225 : f32 to vector<1x128xf32>
    %227 = arith.mulf %192, %226 : vector<1x128xf32>
    %228 = arith.addf %224, %227 : vector<1x128xf32>
    %c61 = arith.constant 61 : index
    %229 = memref.load %arg1[%c61] : memref<76xf32, #tpu.memory_space<smem>>
    %230 = vector.broadcast %229 : f32 to vector<1x128xf32>
    %231 = arith.mulf %207, %230 : vector<1x128xf32>
    %232 = arith.addf %228, %231 : vector<1x128xf32>
    %c69 = arith.constant 69 : index
    %233 = memref.load %arg1[%c69] : memref<76xf32, #tpu.memory_space<smem>>
    %234 = vector.broadcast %233 : f32 to vector<1x128xf32>
    %235 = arith.addf %232, %234 : vector<1x128xf32>
    %c46 = arith.constant 46 : index
    %236 = memref.load %arg1[%c46] : memref<76xf32, #tpu.memory_space<smem>>
    %237 = vector.broadcast %236 : f32 to vector<1x128xf32>
    %238 = arith.mulf %177, %237 : vector<1x128xf32>
    %c54 = arith.constant 54 : index
    %239 = memref.load %arg1[%c54] : memref<76xf32, #tpu.memory_space<smem>>
    %240 = vector.broadcast %239 : f32 to vector<1x128xf32>
    %241 = arith.mulf %192, %240 : vector<1x128xf32>
    %242 = arith.addf %238, %241 : vector<1x128xf32>
    %c62 = arith.constant 62 : index
    %243 = memref.load %arg1[%c62] : memref<76xf32, #tpu.memory_space<smem>>
    %244 = vector.broadcast %243 : f32 to vector<1x128xf32>
    %245 = arith.mulf %207, %244 : vector<1x128xf32>
    %246 = arith.addf %242, %245 : vector<1x128xf32>
    %c70 = arith.constant 70 : index
    %247 = memref.load %arg1[%c70] : memref<76xf32, #tpu.memory_space<smem>>
    %248 = vector.broadcast %247 : f32 to vector<1x128xf32>
    %249 = arith.addf %246, %248 : vector<1x128xf32>
    %c47 = arith.constant 47 : index
    %250 = memref.load %arg1[%c47] : memref<76xf32, #tpu.memory_space<smem>>
    %251 = vector.broadcast %250 : f32 to vector<1x128xf32>
    %252 = arith.mulf %177, %251 : vector<1x128xf32>
    %c55 = arith.constant 55 : index
    %253 = memref.load %arg1[%c55] : memref<76xf32, #tpu.memory_space<smem>>
    %254 = vector.broadcast %253 : f32 to vector<1x128xf32>
    %255 = arith.mulf %192, %254 : vector<1x128xf32>
    %256 = arith.addf %252, %255 : vector<1x128xf32>
    %c63 = arith.constant 63 : index
    %257 = memref.load %arg1[%c63] : memref<76xf32, #tpu.memory_space<smem>>
    %258 = vector.broadcast %257 : f32 to vector<1x128xf32>
    %259 = arith.mulf %207, %258 : vector<1x128xf32>
    %260 = arith.addf %256, %259 : vector<1x128xf32>
    %c71 = arith.constant 71 : index
    %261 = memref.load %arg1[%c71] : memref<76xf32, #tpu.memory_space<smem>>
    %262 = vector.broadcast %261 : f32 to vector<1x128xf32>
    %263 = arith.addf %260, %262 : vector<1x128xf32>
    %c48 = arith.constant 48 : index
    %264 = memref.load %arg1[%c48] : memref<76xf32, #tpu.memory_space<smem>>
    %265 = vector.broadcast %264 : f32 to vector<1x128xf32>
    %266 = arith.mulf %177, %265 : vector<1x128xf32>
    %c56 = arith.constant 56 : index
    %267 = memref.load %arg1[%c56] : memref<76xf32, #tpu.memory_space<smem>>
    %268 = vector.broadcast %267 : f32 to vector<1x128xf32>
    %269 = arith.mulf %192, %268 : vector<1x128xf32>
    %270 = arith.addf %266, %269 : vector<1x128xf32>
    %c64 = arith.constant 64 : index
    %271 = memref.load %arg1[%c64] : memref<76xf32, #tpu.memory_space<smem>>
    %272 = vector.broadcast %271 : f32 to vector<1x128xf32>
    %273 = arith.mulf %207, %272 : vector<1x128xf32>
    %274 = arith.addf %270, %273 : vector<1x128xf32>
    %c72 = arith.constant 72 : index
    %275 = memref.load %arg1[%c72] : memref<76xf32, #tpu.memory_space<smem>>
    %276 = vector.broadcast %275 : f32 to vector<1x128xf32>
    %277 = arith.addf %274, %276 : vector<1x128xf32>
    %c49 = arith.constant 49 : index
    %278 = memref.load %arg1[%c49] : memref<76xf32, #tpu.memory_space<smem>>
    %279 = vector.broadcast %278 : f32 to vector<1x128xf32>
    %280 = arith.mulf %177, %279 : vector<1x128xf32>
    %c57 = arith.constant 57 : index
    %281 = memref.load %arg1[%c57] : memref<76xf32, #tpu.memory_space<smem>>
    %282 = vector.broadcast %281 : f32 to vector<1x128xf32>
    %283 = arith.mulf %192, %282 : vector<1x128xf32>
    %284 = arith.addf %280, %283 : vector<1x128xf32>
    %c65 = arith.constant 65 : index
    %285 = memref.load %arg1[%c65] : memref<76xf32, #tpu.memory_space<smem>>
    %286 = vector.broadcast %285 : f32 to vector<1x128xf32>
    %287 = arith.mulf %207, %286 : vector<1x128xf32>
    %288 = arith.addf %284, %287 : vector<1x128xf32>
    %c73 = arith.constant 73 : index
    %289 = memref.load %arg1[%c73] : memref<76xf32, #tpu.memory_space<smem>>
    %290 = vector.broadcast %289 : f32 to vector<1x128xf32>
    %291 = arith.addf %288, %290 : vector<1x128xf32>
    %c50 = arith.constant 50 : index
    %292 = memref.load %arg1[%c50] : memref<76xf32, #tpu.memory_space<smem>>
    %293 = vector.broadcast %292 : f32 to vector<1x128xf32>
    %294 = arith.mulf %177, %293 : vector<1x128xf32>
    %c58 = arith.constant 58 : index
    %295 = memref.load %arg1[%c58] : memref<76xf32, #tpu.memory_space<smem>>
    %296 = vector.broadcast %295 : f32 to vector<1x128xf32>
    %297 = arith.mulf %192, %296 : vector<1x128xf32>
    %298 = arith.addf %294, %297 : vector<1x128xf32>
    %c66 = arith.constant 66 : index
    %299 = memref.load %arg1[%c66] : memref<76xf32, #tpu.memory_space<smem>>
    %300 = vector.broadcast %299 : f32 to vector<1x128xf32>
    %301 = arith.mulf %207, %300 : vector<1x128xf32>
    %302 = arith.addf %298, %301 : vector<1x128xf32>
    %c74 = arith.constant 74 : index
    %303 = memref.load %arg1[%c74] : memref<76xf32, #tpu.memory_space<smem>>
    %304 = vector.broadcast %303 : f32 to vector<1x128xf32>
    %305 = arith.addf %302, %304 : vector<1x128xf32>
    %c51 = arith.constant 51 : index
    %306 = memref.load %arg1[%c51] : memref<76xf32, #tpu.memory_space<smem>>
    %307 = vector.broadcast %306 : f32 to vector<1x128xf32>
    %308 = arith.mulf %177, %307 : vector<1x128xf32>
    %c59 = arith.constant 59 : index
    %309 = memref.load %arg1[%c59] : memref<76xf32, #tpu.memory_space<smem>>
    %310 = vector.broadcast %309 : f32 to vector<1x128xf32>
    %311 = arith.mulf %192, %310 : vector<1x128xf32>
    %312 = arith.addf %308, %311 : vector<1x128xf32>
    %c67 = arith.constant 67 : index
    %313 = memref.load %arg1[%c67] : memref<76xf32, #tpu.memory_space<smem>>
    %314 = vector.broadcast %313 : f32 to vector<1x128xf32>
    %315 = arith.mulf %207, %314 : vector<1x128xf32>
    %316 = arith.addf %312, %315 : vector<1x128xf32>
    %c75 = arith.constant 75 : index
    %317 = memref.load %arg1[%c75] : memref<76xf32, #tpu.memory_space<smem>>
    %318 = vector.broadcast %317 : f32 to vector<1x128xf32>
    %319 = arith.addf %316, %318 : vector<1x128xf32>
    %c0_31 = arith.constant 0 : index
    %c0_32 = arith.constant 0 : index
    %320 = vector.load %arg3[%c0_31, %c0_32] : memref<8x128xf32, #tpu.memory_space<vmem>>, vector<1x128xf32>
    tpu.vector_store %arg3[%c0_31, %c0_32], %221 {strides = array<i32>} : memref<8x128xf32, #tpu.memory_space<vmem>>, vector<1x128xf32>,
    %c1_33 = arith.constant 1 : index
    %c0_34 = arith.constant 0 : index
    %321 = vector.load %arg3[%c1_33, %c0_34] : memref<8x128xf32, #tpu.memory_space<vmem>>, vector<1x128xf32>
    tpu.vector_store %arg3[%c1_33, %c0_34], %235 {strides = array<i32>} : memref<8x128xf32, #tpu.memory_space<vmem>>, vector<1x128xf32>,
    %c2_35 = arith.constant 2 : index
    %c0_36 = arith.constant 0 : index
    %322 = vector.load %arg3[%c2_35, %c0_36] : memref<8x128xf32, #tpu.memory_space<vmem>>, vector<1x128xf32>
    tpu.vector_store %arg3[%c2_35, %c0_36], %249 {strides = array<i32>} : memref<8x128xf32, #tpu.memory_space<vmem>>, vector<1x128xf32>,
    %c3_37 = arith.constant 3 : index
    %c0_38 = arith.constant 0 : index
    %323 = vector.load %arg3[%c3_37, %c0_38] : memref<8x128xf32, #tpu.memory_space<vmem>>, vector<1x128xf32>
    tpu.vector_store %arg3[%c3_37, %c0_38], %263 {strides = array<i32>} : memref<8x128xf32, #tpu.memory_space<vmem>>, vector<1x128xf32>,
    %c4_39 = arith.constant 4 : index
    %c0_40 = arith.constant 0 : index
    %324 = vector.load %arg3[%c4_39, %c0_40] : memref<8x128xf32, #tpu.memory_space<vmem>>, vector<1x128xf32>
    tpu.vector_store %arg3[%c4_39, %c0_40], %277 {strides = array<i32>} : memref<8x128xf32, #tpu.memory_space<vmem>>, vector<1x128xf32>,
    %c5_41 = arith.constant 5 : index
    %c0_42 = arith.constant 0 : index
    %325 = vector.load %arg3[%c5_41, %c0_42] : memref<8x128xf32, #tpu.memory_space<vmem>>, vector<1x128xf32>
    tpu.vector_store %arg3[%c5_41, %c0_42], %291 {strides = array<i32>} : memref<8x128xf32, #tpu.memory_space<vmem>>, vector<1x128xf32>,
    %c6_43 = arith.constant 6 : index
    %c0_44 = arith.constant 0 : index
    %326 = vector.load %arg3[%c6_43, %c0_44] : memref<8x128xf32, #tpu.memory_space<vmem>>, vector<1x128xf32>
    tpu.vector_store %arg3[%c6_43, %c0_44], %305 {strides = array<i32>} : memref<8x128xf32, #tpu.memory_space<vmem>>, vector<1x128xf32>,
    %c7_45 = arith.constant 7 : index
    %c0_46 = arith.constant 0 : index
    %327 = vector.load %arg3[%c7_45, %c0_46] : memref<8x128xf32, #tpu.memory_space<vmem>>, vector<1x128xf32>
    tpu.vector_store %arg3[%c7_45, %c0_46], %319 {strides = array<i32>} : memref<8x128xf32, #tpu.memory_space<vmem>>, vector<1x128xf32>,
    return
  }
  func.func @transform_0(%arg0: i32) -> i32 {
    %c0_i32 = arith.constant 0 : i32
    %c0_i32_0 = arith.constant 0 : i32
    return %c0_i32 : i32
  }
  func.func @transform_1(%arg0: i32) -> (i32, i32) {
    %c0_i32 = arith.constant 0 : i32
    %c0_i32_0 = arith.constant 0 : i32
    return %c0_i32, %arg0 : i32, i32
  }
  func.func @transform_2(%arg0: i32) -> (i32, i32) {
    %c0_i32 = arith.constant 0 : i32
    %c0_i32_0 = arith.constant 0 : i32
    return %c0_i32, %arg0 : i32, i32
  }
}

</mosaic_0001>

<bundles_post_ra>
// kernel: tpu_custom_call.1
= control target key start
LH: loop header
LB: loop body
LE: loop exit
PB: predicated region body
PF: predicated region fallthrough
CT: control target
= control target key end

     0   :  { %7 = vsyncpa [#allocation5], 0  ;;  %s826_s0 = inlined_call_operand.hbm [shape: f32[76], index: 0, kind: input, shape index: {}]   ;;  %s827_s1 = inlined_call_operand.hbm [shape: f32[8,128], index: 1, kind: input, shape index: {}]   ;;  %s828_s2 = inlined_call_operand.hbm [shape: f32[8,128], index: 2, kind: output, shape index: {}]  }
   0x1   :  { %8 = vsyncpa [#allocation3], 0 }
   0x2   :  { %9 = vsyncpa [#allocation4], 0  ;;  %s441_s11 = scalar_lea.hbm %s826_s0, 16 }
   0x3   :  { %p442_p0 = scmp.ne.s32.totalorder %s826_s0, %s441_s11  ;;  %p445_p1 = scmp.lt.u32.totalorder %s441_s11, %s826_s0 }
   0x5   :  { %p447_p2 = pnand %p445_p1, %p442_p0 }
   0x7   :  { %450 = shalt.err (!%p447_p2)
}
   0x8   :  { %s501_s16 = smov [#allocation2]   ;;  %s502_s19 = smov [#allocation6]  }
   0x9   :  { %17 = dma.hbm_to_smem %s826_s0, 16, %s501_s16, [#allocation5]  }
   0xa   :  { %s24_s20 = sshll.u32 %s502_s19, 4  ;;  %s451_s23 = scalar_lea.hbm %s827_s1, 128  ;;  %s25_s20 = int_to_ptr.vmem [resolvable:$true] %s24_s20 }
   0xb   :  { %p452_p3 = scmp.ne.s32.totalorder %s827_s1, %s451_s23  ;;  %p455_p4 = scmp.lt.u32.totalorder %s451_s23, %s827_s1 }
   0xd   :  { %p457_p5 = pnand %p455_p4, %p452_p3 }
   0xf   :  { %460 = shalt.err (!%p457_p5)
}
  0x10   :  { %s461_s28 = scalar_lea.vmem %s25_s20, 128  ;;  %p466_p7 = scmp.lt.s32.totalorder %s25_s20, %s25_s20 }
  0x11   :  { %p462_p6 = scmp.ne.s32.totalorder %s25_s20, %s461_s28  ;;  %p467_p8 = scmp.lt.s32.totalorder %s461_s28, %s461_s28 }
  0x13   :  { %p468_p9 = por %p467_p8, %p466_p7 }
  0x15   :  { %p469_p10 = pnand %p468_p9, %p462_p6 }
  0x17   :  { %472 = shalt.err (!%p469_p10)
}
  0x18   :  { %27 = dma.hbm_to_vmem [thread:$0]  %s827_s1, 128, %s25_s20, [#allocation3]  }
  0x19   :  { %495 = dma.done.wait [#allocation5], 16  }
  0x1a   :  { %496 = vsyncadd [#allocation5], 4294967280 }
  0x1b   :  { %497 = dma.done.wait [#allocation3], 128  }
  0x1c   :  { %498 = vsyncadd [#allocation3], 4294967168 }
  0x1d   :  { %34 = sfence }
  0x1e   :  { %s43_s30 = sld [smem:[#allocation2]]  ;;  %s363_s3 = sld [smem:[#allocation2 + $0x3]]  ;;  %v547_v0 = vld [vmem:[#allocation6] sm:$0x1]  ;;  %v549_v1 = vld [vmem:[#allocation6 + $0x1] sm:$0x1] }
  0x1f   :  { %s364_s4 = sld [smem:[#allocation2 + $0x6]]  ;;  %s365_s5 = sld [smem:[#allocation2 + $0x9]]  ;;  %v553_v2 = vld [vmem:[#allocation6 + $0x2] sm:$0x1]  ;;  %v559_v3 = vld [vmem:[#allocation6 + $0x3] sm:$0x1] }
  0x20   :  { %s366_s6 = sld [smem:[#allocation2 + $0xc]]  ;;  %s543_s7 = sld [smem:[#allocation2 + $0xf]]  ;;  %v565_v5 = vld [vmem:[#allocation6 + $0x4] sm:$0x1]  ;;  %v587_v17 = vld [vmem:[#allocation6 + $0x5] sm:$0x1] }
  0x21   :  { %s545_s8 = sld [smem:[#allocation2 + $0x12]]  ;;  %s551_s9 = sld [smem:[#allocation2 + $0x15]]  ;;  %v597_v22 = vld [vmem:[#allocation6 + $0x6] sm:$0x1]  ;;  %v599_v23 = vld [vmem:[#allocation6 + $0x7] sm:$0x1] }
  0x22   :  { %s555_s1 = sld [smem:[#allocation2 + $0x1]]  ;;  %s557_s10 = sld [smem:[#allocation2 + $0x4]] }
  0x23   :  { %s561_s11 = sld [smem:[#allocation2 + $0x7]]  ;;  %s563_s12 = sld [smem:[#allocation2 + $0xa]] }
  0x24   :  { %v44_v4 = vstv %s43_s30  ;;  %v47_v7 = vstv %s363_s3  ;;  %s568_s13 = sld [smem:[#allocation2 + $0xd]]  ;;  %s570_s14 = sld [smem:[#allocation2 + $0x10]] }
  0x25   :  { %v45_v6 = vmul.f32 %v44_v4, %v547_v0  ;;  %v51_v8 = vstv %s364_s4  ;;  %v48_v9 = vmul.f32 %v47_v7, %v549_v1  ;;  %v55_v11 = vstv %s365_s5  ;;  %s574_s15 = sld [smem:[#allocation2 + $0x13]]  ;;  %s576_s16 = sld [smem:[#allocation2 + $0x16]] }
  0x26   :  { %v52_v10 = vmul.f32 %v51_v8, %v553_v2  ;;  %v59_v12 = vstv %s366_s6  ;;  %s578_s17 = sld [smem:[#allocation2 + $0x2]]  ;;  %v56_v14 = vmul.f32 %v55_v11, %v559_v3  ;;  %v63_v16 = vstv %s543_s7  ;;  %s583_s18 = sld [smem:[#allocation2 + $0x5]] }
  0x27   :  { %v49_v13 = vadd.f32 %v48_v9, %v45_v6  ;;  %v60_v15 = vmul.f32 %v59_v12, %v565_v5  ;;  %s585_s19 = sld [smem:[#allocation2 + $0x8]]  ;;  %v67_v18 = vstv %s545_s8  ;;  %v71_v19 = vstv %s551_s9  ;;  %s593_s20 = sld [smem:[#allocation2 + $0xb]] }
  0x28   :  { %v81_v20 = vstv %s555_s1  ;;  %v84_v21 = vstv %s557_s10  ;;  %s595_s21 = sld [smem:[#allocation2 + $0xe]]  ;;  %s604_s22 = sld [smem:[#allocation2 + $0x18]]  ;;  %v64_v33 = vmul.f32 %v63_v16, %v587_v17  ;;  %v68_v36 = vmul.f32 %v67_v18, %v597_v22 }
  0x29   :  { %v53_v24 = vadd.f32 %v52_v10, %v49_v13  ;;  %v82_v25 = vmul.f32 %v81_v20, %v547_v0  ;;  %v85_v26 = vmul.f32 %v84_v21, %v549_v1  ;;  %v88_v27 = vstv %s561_s11  ;;  %s610_s23 = sld [smem:[#allocation2 + $0x11]]  ;;  %s618_s24 = sld [smem:[#allocation2 + $0x14]] }
  0x2a   :  { %v89_v28 = vmul.f32 %v88_v27, %v553_v2  ;;  %v92_v29 = vstv %s563_s12  ;;  %v96_v30 = vstv %s568_s13  ;;  %v100_v31 = vstv %s570_s14  ;;  %s622_s25 = sld [smem:[#allocation2 + $0x19]]  ;;  %s628_s26 = sld [smem:[#allocation2 + $0x17]] }
  0x2b   :  { %v57_v32 = vadd.f32 %v56_v14, %v53_v24  ;;  %v86_v34 = vadd.f32 %v85_v26, %v82_v25  ;;  %v93_v35 = vmul.f32 %v92_v29, %v559_v3  ;;  %v72_v37 = vmul.f32 %v71_v19, %v599_v23  ;;  %s636_s27 = sld [smem:[#allocation2 + $0x1b]]  ;;  %s638_s28 = sld [smem:[#allocation2 + $0x1d]] }
  0x2c   :  { %v97_v38 = vmul.f32 %v96_v30, %v565_v5  ;;  %v101_v39 = vmul.f32 %v100_v31, %v587_v17  ;;  %v104_v42 = vstv %s574_s15  ;;  %v108_v43 = vstv %s576_s16  ;;  %s643_s0 = sld [smem:[#allocation2 + $0x1c]]  ;;  %s645_s29 = sld [smem:[#allocation2 + $0x1e]] }
  0x2d   :  { %v61_v40 = vadd.f32 %v60_v15, %v57_v32  ;;  %v90_v41 = vadd.f32 %v89_v28, %v86_v34  ;;  %v118_v44 = vstv %s578_s17  ;;  %v121_v45 = vstv %s583_s18  ;;  %s649_s30 = sld [smem:[#allocation2 + $0x1a]]  ;;  %s652_s3 = sld [smem:[#allocation2 + $0x1f]] }
  0x2e   :  { %v125_v46 = vstv %s585_s19  ;;  %v129_v47 = vstv %s593_s20  ;;  %v119_v50 = vmul.f32 %v118_v44, %v547_v0  ;;  %v122_v51 = vmul.f32 %v121_v45, %v549_v1  ;;  %s656_s4 = sld [smem:[#allocation2 + $0x21]]  ;;  %s658_s5 = sld [smem:[#allocation2 + $0x20]] }
  0x2f   :  { %v65_v48 = vadd.f32 %v64_v33, %v61_v40  ;;  %v94_v49 = vadd.f32 %v93_v35, %v90_v41  ;;  %v105_v52 = vmul.f32 %v104_v42, %v597_v22  ;;  %v126_v53 = vmul.f32 %v125_v46, %v553_v2  ;;  %s661_s6 = sld [smem:[#allocation2 + $0x22]]  ;;  %s663_s7 = sld [smem:[#allocation2 + $0x23]] }
  0x30   :  { %v133_v54 = vstv %s595_s21  ;;  %v123_v57 = vadd.f32 %v122_v51, %v119_v50  ;;  %v130_v58 = vmul.f32 %v129_v47, %v559_v3  ;;  %v75_v59 = vstv %s604_s22  ;;  %s665_s8 = sld [smem:[#allocation2 + $0x26]]  ;;  %s667_s9 = sld [smem:[#allocation2 + $0x29]] }
  0x31   :  { %v69_v55 = vadd.f32 %v68_v36, %v65_v48  ;;  %v98_v56 = vadd.f32 %v97_v38, %v94_v49  ;;  %v109_v60 = vmul.f32 %v108_v43, %v599_v23  ;;  %v137_v61 = vstv %s610_s23  ;;  %s670_s1 = sld [smem:[#allocation2 + $0x24]]  ;;  %s672_s10 = sld [smem:[#allocation2 + $0x27]] }
  0x32   :  { %v127_v0 = vadd.f32 %v126_v53, %v123_v57  ;;  %v134_v1 = vmul.f32 %v133_v54, %v565_v5  ;;  %v141_v2 = vstv %s618_s24  ;;  %v138_v7 = vmul.f32 %v137_v61, %v587_v17  ;;  %s678_s11 = sld [smem:[#allocation2 + $0x2a]]  ;;  %s680_s12 = sld [smem:[#allocation2 + $0x25]] }
  0x33   :  { %v73_v62 = vadd.f32 %v72_v37, %v69_v55  ;;  %v102_v63 = vadd.f32 %v101_v39, %v98_v56  ;;  %v112_v8 = vstv %s622_s25  ;;  %v145_v9 = vstv %s628_s26  ;;  %s682_s13 = sld [smem:[#allocation2 + $0x28]]  ;;  %s685_s14 = sld [smem:[#allocation2 + $0x2b]] }
  0x34   :  { %v131_v6 = vadd.f32 %v130_v58, %v127_v0  ;;  %v142_v12 = vmul.f32 %v141_v2, %v597_v22  ;;  %v146_v15 = vmul.f32 %v145_v9, %v599_v23  ;;  %v155_v16 = vstv %s636_s27  ;;  %s687_s15 = sld [smem:[#allocation2 + $0x2c]]  ;;  %s695_s19 = sld [smem:[#allocation2 + $0x2d]] }
  0x35   :  { %v76_v3 = vadd.f32 %v75_v59, %v73_v62  ;;  %v106_v4 = vadd.f32 %v105_v52, %v102_v63  ;;  %v158_v17 = vstv %s638_s28  ;;  %v172_v18 = vstv %s643_s0  ;;  %s689_s16 = sld [smem:[#allocation2 + $0x34]]  ;;  %s697_s20 = sld [smem:[#allocation2 + $0x35]] }
  0x36   :  { %v135_v11 = vadd.f32 %v134_v1, %v131_v6  ;;  %v175_v19 = vstv %s645_s29  ;;  %v149_v24 = vstv %s649_s30  ;;  %s691_s17 = sld [smem:[#allocation2 + $0x3c]]  ;;  %s699_s21 = sld [smem:[#allocation2 + $0x3d]]  ;;  %v162_v32 = vstv %s652_s3 }
  0x37   :  { %v78_v10 = vmul.f32 0.22916667, %v76_v3  ;;  %v110_v5 = vadd.f32 %v109_v60, %v106_v4  ;;  %vm77_vm0 = vcmp.ge.f32.partialorder %v76_v3, 0.0  ;;  %s693_s18 = sld [smem:[#allocation2 + $0x44]]  ;;  %s701_s22 = sld [smem:[#allocation2 + $0x45]]  ;;  %v179_v33 = vstv %s658_s5 }
  0x38   :  { %v139_v14 = vadd.f32 %v138_v7, %v135_v11  ;;  %s703_s23 = sld [smem:[#allocation2 + $0x2e]]  ;;  %v166_v37 = vstv %s656_s4  ;;  %s714_s27 = sld [smem:[#allocation2 + $0x2f]]  ;;  %v183_v40 = vstv %s661_s6  ;;  %v189_v41 = vstv %s663_s7 }
  0x39   :  { %v113_v13 = vadd.f32 %v112_v8, %v110_v5  ;;  %v79_v20 = vsel %vm77_vm0, %v76_v3, %v78_v10  ;;  %s707_s24 = sld [smem:[#allocation2 + $0x36]]  ;;  %s716_s28 = sld [smem:[#allocation2 + $0x37]]  ;;  %v192_v42 = vstv %s665_s8  ;;  %v196_v43 = vstv %s667_s9 }
  0x3a   :  { %v143_v22 = vadd.f32 %v142_v12, %v139_v14  ;;  %v156_v26 = vmul.f32 %v155_v16, %v79_v20  ;;  %v173_v28 = vmul.f32 %v172_v18, %v79_v20  ;;  %s709_s25 = sld [smem:[#allocation2 + $0x3e]]  ;;  %s720_s0 = sld [smem:[#allocation2 + $0x3f]]  ;;  %v202_v44 = vstv %s670_s1 }
  0x3b   :  { %vm114_vm1 = vcmp.ge.f32.partialorder %v113_v13, 0.0  ;;  %v115_v21 = vmul.f32 0.22916667, %v113_v13  ;;  %s711_s26 = sld [smem:[#allocation2 + $0x46]]  ;;  %s722_s29 = sld [smem:[#allocation2 + $0x47]]  ;;  %v205_v45 = vstv %s672_s10  ;;  %v209_v48 = vstv %s678_s11 }
  0x3c   :  { %v147_v25 = vadd.f32 %v146_v15, %v143_v22  ;;  %s728_s30 = sld [smem:[#allocation2 + $0x30]]  ;;  %v215_v49 = vstv %s680_s12  ;;  %v218_v50 = vstv %s682_s13  ;;  %v222_v51 = vstv %s685_s14  ;;  %s742_s6 = sld [smem:[#allocation2 + $0x31]] }
  0x3d   :  { %v116_v23 = vsel %vm114_vm1, %v113_v13, %v115_v21  ;;  %s730_s3 = sld [smem:[#allocation2 + $0x38]]  ;;  %v228_v52 = vstv %s687_s15  ;;  %v231_v53 = vstv %s689_s16  ;;  %s744_s7 = sld [smem:[#allocation2 + $0x39]]  ;;  %v235_v56 = vstv %s691_s17 }
  0x3e   :  { %v159_v27 = vmul.f32 %v158_v17, %v116_v23  ;;  %v176_v29 = vmul.f32 %v175_v19, %v116_v23  ;;  %v150_v30 = vadd.f32 %v149_v24, %v147_v25  ;;  %s734_s4 = sld [smem:[#allocation2 + $0x40]]  ;;  %v239_v57 = vstv %s693_s18  ;;  %s748_s8 = sld [smem:[#allocation2 + $0x41]] }
  0x3f   :  { %s736_s5 = sld [smem:[#allocation2 + $0x48]]  ;;  %s750_s9 = sld [smem:[#allocation2 + $0x49]]  ;;  %v242_v58 = vstv %s695_s19  ;;  %v245_v59 = vstv %s697_s20  ;;  %v249_v60 = vstv %s699_s21  ;;  %v253_v61 = vstv %s701_s22 }
  0x40   :  { %vm151_vm2 = vcmp.ge.f32.partialorder %v150_v30, 0.0  ;;  %v152_v31 = vmul.f32 0.22916667, %v150_v30  ;;  %v160_v34 = vadd.f32 %v159_v27, %v156_v26  ;;  %v177_v35 = vadd.f32 %v176_v29, %v173_v28  ;;  %s756_s1 = sld [smem:[#allocation2 + $0x32]]  ;;  %s768_s12 = sld [smem:[#allocation2 + $0x33]] }
  0x41   :  { %s758_s10 = sld [smem:[#allocation2 + $0x3a]]  ;;  %v256_v0 = vstv %s703_s23  ;;  %v259_v1 = vstv %s707_s24  ;;  %v263_v2 = vstv %s709_s25  ;;  %v267_v3 = vstv %s711_s26  ;;  %s770_s13 = sld [smem:[#allocation2 + $0x3b]] }
  0x42   :  { %v153_v36 = vsel %vm151_vm2, %v150_v30, %v152_v31  ;;  %v270_v7 = vstv %s714_s27  ;;  %v273_v8 = vstv %s716_s28  ;;  %s766_s11 = sld [smem:[#allocation2 + $0x42]]  ;;  %s772_s14 = sld [smem:[#allocation2 + $0x43]]  ;;  %v277_v14 = vstv %s720_s0 }
  0x43   :  { %v163_v38 = vmul.f32 %v162_v32, %v153_v36  ;;  %v180_v39 = vmul.f32 %v179_v33, %v153_v36  ;;  %v281_v15 = vstv %s722_s29  ;;  %v284_v18 = vstv %s728_s30  ;;  %s796_s15 = sld [smem:[#allocation2 + $0x4a]]  ;;  %s798_s16 = sld [smem:[#allocation2 + $0x4b]] }
  0x44   :  { %v287_v19 = vstv %s730_s3  ;;  %v291_v21 = vstv %s734_s4  ;;  %v298_v24 = vstv %s742_s6  ;;  %v301_v26 = vstv %s744_s7  ;;  %s503_s17 = smov [#allocation7]  }
  0x45   :  { %v164_v46 = vadd.f32 %v163_v38, %v160_v34  ;;  %v181_v47 = vadd.f32 %v180_v39, %v177_v35  ;;  %v295_v22 = vstv %s736_s5  ;;  %v305_v27 = vstv %s748_s8  ;;  %s353_s18 = sshll.u32 %s503_s17, 4  ;;  %s354_s18 = int_to_ptr.vmem [resolvable:$true] %s353_s18 }
  0x46   :  { %v309_v29 = vstv %s750_s9  ;;  %v312_v30 = vstv %s756_s1  ;;  %v326_v36 = vstv %s768_s12  ;;  %s473_s19 = scalar_lea.vmem %s354_s18, 128  ;;  %p478_p12 = scmp.lt.s32.totalorder %s354_s18, %s354_s18 }
  0x47   :  { %v167_v54 = vadd.f32 %v166_v37, %v164_v46  ;;  %v184_v55 = vadd.f32 %v183_v40, %v181_v47  ;;  %v315_v31 = vstv %s758_s10  ;;  %v329_v39 = vstv %s770_s13  ;;  %p474_p11 = scmp.ne.s32.totalorder %s354_s18, %s473_s19  ;;  %p479_p13 = scmp.lt.s32.totalorder %s473_s19, %s473_s19 }
  0x48   :  { %v319_v35 = vstv %s766_s11  ;;  %v333_v40 = vstv %s772_s14 }
  0x49   :  { %vm168_vm3 = vcmp.ge.f32.partialorder %v167_v54, 0.0  ;;  %v169_v62 = vmul.f32 0.22916667, %v167_v54  ;;  %vm185_vm4 = vcmp.ge.f32.partialorder %v184_v55, 0.0  ;;  %v186_v63 = vmul.f32 0.22916667, %v184_v55  ;;  %p480_p0 = por %p479_p13, %p478_p12 }
  0x4b   :  { %v170_v4 = vsel %vm168_vm3, %v167_v54, %v169_v62  ;;  %v187_v6 = vsel %vm185_vm4, %v184_v55, %v186_v63  ;;  %p481_p1 = pnand %p480_p0, %p474_p11 }
  0x4c   :  { %v190_v9 = vmul.f32 %v189_v41, %v170_v4  ;;  %v193_v10 = vmul.f32 %v192_v42, %v187_v6  ;;  %v203_v5 = vmul.f32 %v202_v44, %v170_v4  ;;  %v206_v11 = vmul.f32 %v205_v45, %v187_v6 }
  0x4d   :  { %v216_v12 = vmul.f32 %v215_v49, %v170_v4  ;;  %v219_v13 = vmul.f32 %v218_v50, %v187_v6 }
  0x4e   :  { %v194_v16 = vadd.f32 %v193_v10, %v190_v9  ;;  %v207_v17 = vadd.f32 %v206_v11, %v203_v5 }
  0x4f   :  { %v220_v20 = vadd.f32 %v219_v13, %v216_v12 }
  0x50   :  { %v197_v23 = vadd.f32 %v196_v43, %v194_v16  ;;  %v210_v25 = vadd.f32 %v209_v48, %v207_v17 }
  0x51   :  { %v223_v28 = vadd.f32 %v222_v51, %v220_v20 }
  0x52   :  { %vm198_vm5 = vcmp.ge.f32.partialorder %v197_v23, 0.0  ;;  %v199_v32 = vmul.f32 0.22916667, %v197_v23  ;;  %vm211_vm6 = vcmp.ge.f32.partialorder %v210_v25, 0.0  ;;  %v212_v33 = vmul.f32 0.22916667, %v210_v25 }
  0x53   :  { %vm224_vm7 = vcmp.ge.f32.partialorder %v223_v28, 0.0  ;;  %v225_v34 = vmul.f32 0.22916667, %v223_v28 }
  0x54   :  { %v200_v37 = vsel %vm198_vm5, %v197_v23, %v199_v32  ;;  %v213_v38 = vsel %vm211_vm6, %v210_v25, %v212_v33  ;;  %v323_v23 = vstv %s796_s15 }
  0x55   :  { %v226_v41 = vsel %vm224_vm7, %v223_v28, %v225_v34  ;;  %v229_v42 = vmul.f32 %v228_v52, %v200_v37  ;;  %v232_v43 = vmul.f32 %v231_v53, %v213_v38  ;;  %v243_v44 = vmul.f32 %v242_v58, %v200_v37 }
  0x56   :  { %v236_v45 = vmul.f32 %v235_v56, %v226_v41  ;;  %v246_v46 = vmul.f32 %v245_v59, %v213_v38  ;;  %v250_v47 = vmul.f32 %v249_v60, %v226_v41  ;;  %v257_v48 = vmul.f32 %v256_v0, %v200_v37 }
  0x57   :  { %v233_v49 = vadd.f32 %v232_v43, %v229_v42  ;;  %v260_v50 = vmul.f32 %v259_v1, %v213_v38  ;;  %v264_v51 = vmul.f32 %v263_v2, %v226_v41  ;;  %v271_v54 = vmul.f32 %v270_v7, %v200_v37 }
  0x58   :  { %v247_v55 = vadd.f32 %v246_v46, %v243_v44  ;;  %v274_v62 = vmul.f32 %v273_v8, %v213_v38  ;;  %v278_v63 = vmul.f32 %v277_v14, %v226_v41  ;;  %v285_v4 = vmul.f32 %v284_v18, %v200_v37 }
  0x59   :  { %v237_v52 = vadd.f32 %v236_v45, %v233_v49  ;;  %v261_v53 = vadd.f32 %v260_v50, %v257_v48  ;;  %v288_v58 = vmul.f32 %v287_v19, %v213_v38  ;;  %v292_v56 = vmul.f32 %v291_v21, %v226_v41 }
  0x5a   :  { %v251_v59 = vadd.f32 %v250_v47, %v247_v55  ;;  %v275_v60 = vadd.f32 %v274_v62, %v271_v54  ;;  %v299_v0 = vmul.f32 %v298_v24, %v200_v37  ;;  %v302_v1 = vmul.f32 %v301_v26, %v213_v38 }
  0x5b   :  { %v240_v2 = vadd.f32 %v239_v57, %v237_v52  ;;  %v265_v6 = vadd.f32 %v264_v51, %v261_v53  ;;  %v289_v7 = vadd.f32 %v288_v58, %v285_v4  ;;  %v306_v8 = vmul.f32 %v305_v27, %v226_v41 }
  0x5c   :  { %v254_v9 = vadd.f32 %v253_v61, %v251_v59  ;;  %v279_v10 = vadd.f32 %v278_v63, %v275_v60  ;;  %v303_v5 = vadd.f32 %v302_v1, %v299_v0  ;;  %v313_v11 = vmul.f32 %v312_v30, %v200_v37 }
  0x5d   :  { %339 = vst [vmem:[#allocation7] sm:$0x1] %v240_v2  ;;  %v268_v12 = vadd.f32 %v267_v3, %v265_v6  ;;  %v293_v13 = vadd.f32 %v292_v56, %v289_v7  ;;  %v316_v14 = vmul.f32 %v315_v31, %v213_v38  ;;  %v320_v16 = vmul.f32 %v319_v35, %v226_v41 }
  0x5e   :  { %340 = vst [vmem:[#allocation7 + $0x1] sm:$0x1] %v254_v9  ;;  %v282_v57 = vadd.f32 %v281_v15, %v279_v10  ;;  %v307_v17 = vadd.f32 %v306_v8, %v303_v5  ;;  %v327_v18 = vmul.f32 %v326_v36, %v200_v37  ;;  %v330_v19 = vmul.f32 %v329_v39, %v213_v38 }
  0x5f   :  { %341 = vst [vmem:[#allocation7 + $0x2] sm:$0x1] %v268_v12  ;;  %v296_v61 = vadd.f32 %v295_v22, %v293_v13  ;;  %v317_v20 = vadd.f32 %v316_v14, %v313_v11  ;;  %v334_v21 = vmul.f32 %v333_v40, %v226_v41  ;;  %v337_v26 = vstv %s798_s16 }
  0x60   :  { %342 = vst [vmem:[#allocation7 + $0x3] sm:$0x1] %v282_v57  ;;  %v310_v24 = vadd.f32 %v309_v29, %v307_v17  ;;  %v331_v3 = vadd.f32 %v330_v19, %v327_v18 }
  0x61   :  { %343 = vst [vmem:[#allocation7 + $0x4] sm:$0x1] %v296_v61  ;;  %v321_v25 = vadd.f32 %v320_v16, %v317_v20 }
  0x62   :  { %344 = vst [vmem:[#allocation7 + $0x5] sm:$0x1] %v310_v24  ;;  %v335_v15 = vadd.f32 %v334_v21, %v331_v3 }
  0x63   :  { %v324_v27 = vadd.f32 %v323_v23, %v321_v25 }
  0x64   :  { %v338_v28 = vadd.f32 %v337_v26, %v335_v15 }
  0x65   :  { %345 = vst [vmem:[#allocation7 + $0x6] sm:$0x1] %v324_v27 }
  0x66   :  { %346 = vst [vmem:[#allocation7 + $0x7] sm:$0x1] %v338_v28 }
  0x67   :  { %484 = shalt.err (!%p481_p1)
}
  0x68   :  { %s485_s22 = scalar_lea.hbm %s828_s2, 128 }
  0x69   :  { %p486_p2 = scmp.ne.s32.totalorder %s828_s2, %s485_s22  ;;  %p489_p3 = scmp.lt.u32.totalorder %s485_s22, %s828_s2 }
  0x6b   :  { %p491_p4 = pnand %p489_p3, %p486_p2 }
  0x6d   :  { %494 = shalt.err (!%p491_p4)
}
  0x6e   :  { %356 = dma.vmem_to_hbm [thread:$0]  %s354_s18, 128, %s828_s2, [#allocation4]  }
  0x6f   :  { %499 = dma.done.wait [#allocation4], 128  }
  0x70   :  { %500 = vsyncadd [#allocation4], 4294967168 }
  0x71   :  { %360 = vsyncpa [#allocation3], 1 }
  0x72   :  { %361 = vsyncpa [#allocation4], 1 }
  0x73   :  { %362 = vsyncpa [#allocation5], 1 }

</bundles_post_ra>
